<compile_context>
chip_gen: v7x
topology: tpu7x:2x2x1
jax: 0.10.0
libtpu: 0.0.40
codegen_flags: <defaults>
</compile_context>

<pallas_src>
import jax
import jax.numpy as jnp
from jax import lax
from jax.experimental import pallas as pl
from jax.experimental.pallas import tpu as pltpu


def attention_kernel(x_ref, wa_ref, ba_ref, ua_ref, bu_ref, o_ref):
    # x_ref : (tm, D)  float32 rows (flattened batch*seq tile)
    # wa_ref: (H, D)   bf16   nn.Linear layout (out_features, in_features)
    # ba_ref: (1, H)   f32
    # ua_ref: (D, H)   bf16
    # bu_ref: (1, D)   f32
    # o_ref : (tm, 1)
    x = x_ref[...]                                     # f32, reused below

    # scores = tanh(x @ Wa^T + ba)  : (tm, H); contract D of x with D of Wa.
    s = lax.dot_general(
        x.astype(jnp.bfloat16), wa_ref[...],
        (((1,), (1,)), ((), ())),
        preferred_element_type=jnp.float32,
    )
    scores = jnp.tanh(s + ba_ref[...])                 # f32 elementwise

    # logits = scores @ Ua^T + bu   : (tm, D); contract H of scores with H of Ua.
    logits = lax.dot_general(
        scores.astype(jnp.bfloat16), ua_ref[...],
        (((1,), (1,)), ((), ())),
        preferred_element_type=jnp.float32,
    ) + bu_ref[...]

    # Softmax over the feature dim, normalization folded into the reduction:
    # out = sum(e * x) / sum(e).  Keep max-subtraction for overflow safety.
    m = jnp.max(logits, axis=-1, keepdims=True)
    e = jnp.exp(logits - m)
    num = jnp.sum(e * x, axis=-1, keepdims=True)       # (tm, 1)
    den = jnp.sum(e, axis=-1, keepdims=True)           # (tm, 1)
    o_ref[...] = (num * pl.reciprocal(den, approx=True)).astype(o_ref.dtype)


def _round_up(a, b):
    return ((a + b - 1) // b) * b


def attention_forward(x, wa, ba, ua, bu, *, tile_m=2048):
    """x: (B, S, D); wa: (H, D); ba: (H,); ua: (D, H); bu: (D,)  ->  (B, S)."""
    B, S, D = x.shape
    H = wa.shape[0]
    M = B * S

    # Row tile: large (amortizes ~0.35 us/step) but never larger than needed.
    tm = min(_round_up(tile_m, 8), _round_up(M, 8))
    M_pad = _round_up(M, tm)

    x2 = x.reshape(M, D)
    if M_pad != M:
        x2 = jnp.pad(x2, ((0, M_pad - M), (0, 0)))     # padded rows discarded

    # bf16 weight copies for the MXU (in a real model, make these once at init).
    wa_bf = wa.astype(jnp.bfloat16)                    # (H, D)
    ua_bf = ua.astype(jnp.bfloat16)                    # (D, H)
    ba2 = ba.reshape(1, H).astype(jnp.float32)
    bu2 = bu.reshape(1, D).astype(jnp.float32)

    out = pl.pallas_call(
        attention_kernel,
        out_shape=jax.ShapeDtypeStruct((M_pad, 1), x.dtype),
        grid=(M_pad // tm,),
        in_specs=[
            pl.BlockSpec((tm, D), lambda i: (i, 0)),   # x row tile
            pl.BlockSpec((H, D), lambda i: (0, 0)),    # Wa (resident)
            pl.BlockSpec((1, H), lambda i: (0, 0)),    # Wa bias
            pl.BlockSpec((D, H), lambda i: (0, 0)),    # Ua (resident)
            pl.BlockSpec((1, D), lambda i: (0, 0)),    # Ua bias
        ],
        out_specs=pl.BlockSpec((tm, 1), lambda i: (i, 0)),
        compiler_params=pltpu.CompilerParams(
            dimension_semantics=("parallel",),         # shards tiles on v7x
        ),
    )(x2, wa_bf, ba2, ua_bf, bu2)
    return out[:M, 0].reshape(B, S)


def reference_forward(x, wa, ba, ua, bu):
    scores = jnp.tanh(jnp.einsum("bsd,hd->bsh", x, wa) + ba)
    logits = jnp.einsum("bsh,dh->bsd", scores, ua) + bu
    attn = jax.nn.softmax(logits, axis=2)
    return jnp.sum(attn * x, axis=2)


if __name__ == "__main__":
    B, S, D, H = 2, 8, 32, 16  # batch, seq, input_dim, hidden_dim

    key = jax.random.PRNGKey(0)
    kx, kwa, kba, kua, kbu = jax.random.split(key, 5)

    x = jax.random.normal(kx, (B, S, D), dtype=jnp.float32)
    # nn.Linear parameter shapes: Wa.weight (H, D), Wa.bias (H,),
    #                             Ua.weight (D, H), Ua.bias (D,)
    wa = jax.random.normal(kwa, (H, D), dtype=jnp.float32) * 0.1
    ba = jax.random.normal(kba, (H,), dtype=jnp.float32) * 0.1
    ua = jax.random.normal(kua, (D, H), dtype=jnp.float32) * 0.1
    bu = jax.random.normal(kbu, (D,), dtype=jnp.float32) * 0.1

    out = attention_forward(x, wa, ba, ua, bu)
    out = jax.block_until_ready(out)

    ref = reference_forward(x, wa, ba, ua, bu)
    assert out.shape == (B, S), out.shape
    # Tolerance accounts for bf16 MXU inputs + approx-reciprocal softmax denom.
    assert jnp.allclose(out, ref, atol=2e-2, rtol=2e-2), (
        f"max abs err {jnp.max(jnp.abs(out - ref))}"
    )
    print("KERNEL_OK")
</pallas_src>

<mosaic_0001>
module attributes {stable_mosaic.version = 11 : i64} {
  func.func @attention_kernel(%arg0: i32, %arg1: memref<16x32xf32, #tpu.memory_space<vmem>>, %arg2: memref<16x32xbf16, #tpu.memory_space<vmem>>, %arg3: memref<1x16xf32, #tpu.memory_space<vmem>>, %arg4: memref<32x16xbf16, #tpu.memory_space<vmem>>, %arg5: memref<1x32xf32, #tpu.memory_space<vmem>>, %arg6: memref<16x1xf32, #tpu.memory_space<vmem>>) attributes {dimension_semantics = [#tpu.dimension_semantics<parallel>], iteration_bounds = array<i64: 1>, scalar_prefetch = 0 : i64, scratch_operands = 0 : i64, tpu.core_type = #tpu.core_type<tc>, window_params = [{transform_indices = @transform_0, window_bounds = array<i64: 16, 32>}, {pipeline_mode = #tpu.pipeline_mode<synchronous>, transform_indices = @transform_1, window_bounds = array<i64: 16, 32>}, {pipeline_mode = #tpu.pipeline_mode<synchronous>, transform_indices = @transform_2, window_bounds = array<i64: 1, 16>}, {pipeline_mode = #tpu.pipeline_mode<synchronous>, transform_indices = @transform_3, window_bounds = array<i64: 32, 16>}, {pipeline_mode = #tpu.pipeline_mode<synchronous>, transform_indices = @transform_4, window_bounds = array<i64: 1, 32>}, {transform_indices = @transform_5, window_bounds = array<i64: 16, 1>}]} {
    %c0 = arith.constant 0 : index
    %c0_0 = arith.constant 0 : index
    %0 = vector.load %arg1[%c0, %c0_0] : memref<16x32xf32, #tpu.memory_space<vmem>>, vector<16x32xf32>
    %1 = arith.truncf %0 : vector<16x32xf32> to vector<16x32xbf16>
    %c0_1 = arith.constant 0 : index
    %c0_2 = arith.constant 0 : index
    %2 = vector.load %arg2[%c0_1, %c0_2] : memref<16x32xbf16, #tpu.memory_space<vmem>>, vector<16x32xbf16>
    %cst = arith.constant dense<0.000000e+00> : vector<16x16xf32>
    %3 = tpu.matmul %1, %2, %cst {dimension_numbers = #tpu.dot_dimension_numbers<[1], [1], [0], [0], [0, 0, 1, 0], [], []>} : vector<16x32xbf16>, vector<16x32xbf16>, vector<16x16xf32> -> vector<16x16xf32>
    %c0_3 = arith.constant 0 : index
    %c0_4 = arith.constant 0 : index
    %4 = vector.load %arg3[%c0_3, %c0_4] : memref<1x16xf32, #tpu.memory_space<vmem>>, vector<1x16xf32>
    %5 = vector.broadcast %4 : vector<1x16xf32> to vector<16x16xf32>
    %6 = arith.addf %3, %5 : vector<16x16xf32>
    %7 = math.tanh %6 : vector<16x16xf32>
    %8 = arith.truncf %7 : vector<16x16xf32> to vector<16x16xbf16>
    %c0_5 = arith.constant 0 : index
    %c0_6 = arith.constant 0 : index
    %9 = vector.load %arg4[%c0_5, %c0_6] : memref<32x16xbf16, #tpu.memory_space<vmem>>, vector<32x16xbf16>
    %cst_7 = arith.constant dense<0.000000e+00> : vector<16x32xf32>
    %10 = tpu.matmul %8, %9, %cst_7 {dimension_numbers = #tpu.dot_dimension_numbers<[1], [1], [0], [0], [0, 0, 1, 0], [], []>} : vector<16x16xbf16>, vector<32x16xbf16>, vector<16x32xf32> -> vector<16x32xf32>
    %c0_8 = arith.constant 0 : index
    %c0_9 = arith.constant 0 : index
    %11 = vector.load %arg5[%c0_8, %c0_9] : memref<1x32xf32, #tpu.memory_space<vmem>>, vector<1x32xf32>
    %12 = vector.broadcast %11 : vector<1x32xf32> to vector<16x32xf32>
    %13 = arith.addf %10, %12 : vector<16x32xf32>
    %cst_10 = arith.constant dense<0xFF800000> : vector<16xf32>
    %14 = vector.multi_reduction <maximumf>, %13, %cst_10 [1] : vector<16x32xf32> to vector<16xf32>
    %15 = vector.shape_cast %14 : vector<16xf32> to vector<16x1xf32>
    %16 = vector.broadcast %15 : vector<16x1xf32> to vector<16x32xf32>
    %17 = arith.subf %13, %16 : vector<16x32xf32>
    %18 = math.exp %17 : vector<16x32xf32>
    %19 = arith.mulf %18, %0 : vector<16x32xf32>
    %cst_11 = arith.constant dense<0.000000e+00> : vector<16xf32>
    %20 = vector.multi_reduction <add>, %19, %cst_11 [1] : vector<16x32xf32> to vector<16xf32>
    %21 = vector.shape_cast %20 : vector<16xf32> to vector<16x1xf32>
    %cst_12 = arith.constant dense<0.000000e+00> : vector<16xf32>
    %22 = vector.multi_reduction <add>, %18, %cst_12 [1] : vector<16x32xf32> to vector<16xf32>
    %23 = vector.shape_cast %22 : vector<16xf32> to vector<16x1xf32>
    %24 = tpu.reciprocal %23 {approx = true} : vector<16x1xf32> -> vector<16x1xf32>
    %25 = arith.mulf %21, %24 : vector<16x1xf32>
    %c0_13 = arith.constant 0 : index
    %c0_14 = arith.constant 0 : index
    %26 = vector.load %arg6[%c0_13, %c0_14] : memref<16x1xf32, #tpu.memory_space<vmem>>, vector<16x1xf32>
    tpu.vector_store %arg6[%c0_13, %c0_14], %25 {strides = array<i32>} : memref<16x1xf32, #tpu.memory_space<vmem>>, vector<16x1xf32>,
    return
  }
  func.func @transform_0(%arg0: i32) -> (i32, i32) {
    %c0_i32 = arith.constant 0 : i32
    %c0_i32_0 = arith.constant 0 : i32
    return %arg0, %c0_i32 : i32, i32
  }
  func.func @transform_1(%arg0: i32) -> (i32, i32) {
    %c0_i32 = arith.constant 0 : i32
    %c0_i32_0 = arith.constant 0 : i32
    %c0_i32_1 = arith.constant 0 : i32
    return %c0_i32, %c0_i32_0 : i32, i32
  }
  func.func @transform_2(%arg0: i32) -> (i32, i32) {
    %c0_i32 = arith.constant 0 : i32
    %c0_i32_0 = arith.constant 0 : i32
    %c0_i32_1 = arith.constant 0 : i32
    return %c0_i32, %c0_i32_0 : i32, i32
  }
  func.func @transform_3(%arg0: i32) -> (i32, i32) {
    %c0_i32 = arith.constant 0 : i32
    %c0_i32_0 = arith.constant 0 : i32
    %c0_i32_1 = arith.constant 0 : i32
    return %c0_i32, %c0_i32_0 : i32, i32
  }
  func.func @transform_4(%arg0: i32) -> (i32, i32) {
    %c0_i32 = arith.constant 0 : i32
    %c0_i32_0 = arith.constant 0 : i32
    %c0_i32_1 = arith.constant 0 : i32
    return %c0_i32, %c0_i32_0 : i32, i32
  }
  func.func @transform_5(%arg0: i32) -> (i32, i32) {
    %c0_i32 = arith.constant 0 : i32
    %c0_i32_0 = arith.constant 0 : i32
    return %arg0, %c0_i32 : i32, i32
  }
}

</mosaic_0001>

<bundles_post_ra>
// kernel: tpu_custom_call.1
= control target key start
LH: loop header
LB: loop body
LE: loop exit
PB: predicated region body
PF: predicated region fallthrough
CT: control target
= control target key end

     0   :  { %vm38_vm0 = vcmask 261120   ;;  %v241_v0 = vmov 0.0   ;;  %vm242_vm1 = vmmov 0   ;;  %vm110_vm2 = vcmask 130048   ;;  %s311_s1 = inlined_call_operand.vmem [shape: bf16[16,32], index: 1, kind: input, shape index: {}]   ;;  %s312_s0 = inlined_call_operand.vmem [shape: f32[16,32], index: 0, kind: input, shape index: {}]   ;;  %s313_s3 = inlined_call_operand.vmem [shape: bf16[32,16], index: 3, kind: input, shape index: {}]   ;;  %s314_s2 = inlined_call_operand.vmem [shape: f32[1,16], index: 2, kind: input, shape index: {}]   ;;  %s315_s4 = inlined_call_operand.vmem [shape: f32[1,32], index: 4, kind: input, shape index: {}]   ;;  %s316_s5 = inlined_call_operand.vmem [shape: f32[16,1], index: 5, kind: output, shape index: {}]  }
   0x1   :  { %210 = vmatprep.subr.bf16.mxu0 %v241_v0  ;;  %v226_v1 = vld [vmem:[%s311_s1] sm:$0xff]   ;;  %212 = vmatprep.mubr.msk.bf16.mxu0 %vm242_vm1, %v241_v0  ;;  %v22_v4 = vld [vmem:[%s312_s0 + $0x8] sm:$0xff]  ;;  %vm191_vm3 = vcmask 7168  }
   0x2   :  { %216 = vmatprep.subr.bf16.mxu1 %v241_v0  ;;  %220 = vmatprep.mubr.msk.bf16.mxu1 %vm242_vm1, %v241_v0  ;;  %v43_v2 = vsel %vm38_vm0, %v226_v1, 0  ;;  %v21_v3 = vld [vmem:[%s312_s0] sm:$0xff]  ;;  %v228_v8 = vld [vmem:[%s313_s3 + $0x8] sm:$0xff]  }
   0x3   :  { %211 = vmatpush3.bf16.xpose.msra.mxu0 %v43_v2  ;;  %v23_v5 = vpack.c.bf16 %v22_v4, %v21_v3  ;;  %v227_v6 = vld [vmem:[%s313_s3] sm:$0xff]   ;;  %v118_v9 = vsel %vm110_vm2, %v228_v8, 0 }
   0x4   :  { %v115_v7 = vsel %vm110_vm2, %v227_v6, 0  ;;  %v198_v10 = vld [vmem:[%s314_s2] ss:$0 sm:$0xff] }
   0x5   :  { %217 = vmatpush3.bf16.xpose.msra.mxu1 %v115_v7  ;;  %v201_v20 = vld [vmem:[%s315_s4] ss:$0 sm:$0xff] }
   0x6   :  { %218 = vmatprep.subr.bf16.mxu1 %v241_v0 }
   0xa   :  { %213 = vmatmul.mubr.msk.bf16.vlgmr.msra.gmra.mrb[0].mxu0 %vm38_vm0, %v23_v5 }
   0xd   :  { %219 = vmatpush3.bf16.xpose.msra.mxu1 %v118_v9 }
  0xdd   :  { %v79_v11 = vpop.f32.mrb[0].mxu0 }
  0xde   :  { %v80_v12 = vadd.f32 %v198_v10, %v79_v11  ;;  %v214_v13 = vpop.f32.mrb[1].mxu0 }
  0xdf   :  { %v82_v14 = vpop.f32.mrb[2].mxu0 }
  0xe0   :  { %v83_v15 = vadd.f32 %v198_v10, %v82_v14  ;;  %v215_v16 = vpop.f32.mrb[3].mxu0  ;;  %229 = vtanh.f32 %v80_v12 }
  0xe2   :  { %231 = vtanh.f32 %v83_v15 }
  0xea   :  { %v230_v17 = vpop.eup %229 }
  0xec   :  { %v232_v18 = vpop.eup %231 }
  0xed   :  { %v88_v19 = vpack.c.bf16 %v232_v18, %v230_v17 }
  0xef   :  { %221 = vmatmul.mubr.msk.bf16.vlgmr.msra.gmra.mrb[0].mxu1 %vm110_vm2, %v88_v19 }
 0x1c2   :  { %v154_v21 = vpop.f32.mrb[0].mxu1 }
 0x1c3   :  { %v155_v22 = vadd.f32 %v201_v20, %v154_v21  ;;  %v222_v23 = vpop.f32.mrb[1].mxu1 }
 0x1c4   :  { %v157_v24 = vpop.f32.mrb[2].mxu1 }
 0x1c5   :  { %v158_v25 = vadd.f32 %v201_v20, %v157_v24  ;;  %v223_v26 = vpop.f32.mrb[3].mxu1  ;;  %v161_v27 = vsel %vm38_vm0, %v155_v22, -inf }
 0x1c6   :  { %162 = vmax.xlane.f32.xlu0 %v161_v27 }
 0x1c7   :  { %v164_v28 = vsel %vm38_vm0, %v158_v25, -inf }
 0x1ca   :  { %165 = vmax.xlane.f32.xlu0 %v164_v28 }
 0x253   :  { %v163_v29 = vpop.xlane.xlu0 %162 }
 0x254   :  { %v167_v30 = vsub.f32 %v155_v22, %v163_v29 }
 0x256   :  { %v169_v31 = vmul.f32 1.442695, %v167_v30 }
 0x257   :  { %v166_v32 = vpop.xlane.xlu0 %165 }
 0x258   :  { %233 = vpow2.f32 %v169_v31  ;;  %v168_v33 = vsub.f32 %v158_v25, %v166_v32 }
 0x25a   :  { %v171_v34 = vmul.f32 1.442695, %v168_v33 }
 0x25c   :  { %235 = vpow2.f32 %v171_v34 }
 0x262   :  { %v234_v35 = vpop.eup %233 }
 0x263   :  { %v181_v36 = vsel %vm38_vm0, %v234_v35, 0.0  ;;  %v173_v37 = vmul.f32 %v234_v35, %v21_v3 }
 0x264   :  { %182 = vadd.xlane.f32.xlu1 %v181_v36 }
 0x265   :  { %v175_v38 = vsel %vm38_vm0, %v173_v37, 0.0 }
 0x266   :  { %v236_v39 = vpop.eup %235  ;;  %176 = vadd.xlane.f32.xlu0 %v175_v38 }
 0x267   :  { %v184_v40 = vsel %vm38_vm0, %v236_v39, 0.0  ;;  %v174_v41 = vmul.f32 %v236_v39, %v22_v4 }
 0x268   :  { %185 = vadd.xlane.f32.xlu1 %v184_v40 }
 0x269   :  { %v178_v42 = vsel %vm38_vm0, %v174_v41, 0.0 }
 0x26c   :  { %179 = vadd.xlane.f32.xlu1 %v178_v42 }
 0x2f1   :  { %v183_v43 = vpop.xlane.xlu1 %182 }
 0x2f2   :  { %237 = vrcp.f32 %v183_v43 }
 0x2f3   :  { %v177_v46 = vpop.xlane.xlu0 %176 }
 0x2f5   :  { %v186_v44 = vpop.xlane.xlu1 %185 }
 0x2f6   :  { %239 = vrcp.f32 %v186_v44 }
 0x2f9   :  { %v180_v49 = vpop.xlane.xlu1 %179 }
 0x2fc   :  { %v238_v45 = vpop.eup %237 }
 0x2fd   :  { %v189_v47 = vmul.f32 %v238_v45, %v177_v46 }
 0x2ff   :  { %192 = vst.msk [vmem:[%s316_s5] sm:$0xff] %vm191_vm3, %v189_v47 }
 0x300   :  { %v240_v48 = vpop.eup %239 }
 0x301   :  { %v190_v50 = vmul.f32 %v240_v48, %v180_v49 }
 0x303   :  { %193 = vst.msk [vmem:[%s316_s5 + $0x8] sm:$0xff] %vm191_vm3, %v190_v50 }

</bundles_post_ra>
